<compile_context>
chip_gen: v6e
topology: v6e:2x2x1
jax: 0.10.0
libtpu: 0.0.40
codegen_flags: <defaults>
</compile_context>

<pallas_src>
import functools

import jax
import jax.numpy as jnp
from jax.experimental import pallas as pl
from jax.experimental.pallas import tpu as pltpu


# ----------------------------------------------------------------------------
# Kernel body (statically specialized via functools.partial)
# ----------------------------------------------------------------------------
def _qkv_kernel(x_ref, w_ref, o_ref, *scratch, tk, num_k, slice_x, acc_mode):
    """One (bm, tn) output tile of  out = x @ w.

    x_ref : (bm, D) resident slab (slice_x=True) or (bm, tk) streamed tile
    w_ref : (tk, tn) streamed weight tile
    o_ref : (bm, tn) output tile (resident across the k grid axis)
    scratch: optional (bm, tn) f32 accumulator (acc_mode == 'scratch')
    """
    if slice_x:
        k = pl.program_id(2)
        x_blk = x_ref[:, pl.ds(pl.multiple_of(k * tk, 128), tk)]
    else:
        x_blk = x_ref[...]

    # bf16 weight streaming: drive the MXU in bf16, accumulate in f32.
    if w_ref.dtype == jnp.bfloat16 and x_blk.dtype != jnp.bfloat16:
        x_blk = x_blk.astype(jnp.bfloat16)

    part = jnp.dot(x_blk, w_ref[...], preferred_element_type=jnp.float32)

    if acc_mode == "none":
        # Single contraction step: no accumulator at all.
        o_ref[...] = part.astype(o_ref.dtype)
    elif acc_mode == "out":
        # f32 output block is resident across k: accumulate straight into it.
        k = pl.program_id(2)

        @pl.when(k == 0)
        def _():
            o_ref[...] = jnp.zeros_like(o_ref)

        o_ref[...] += part
    else:  # "scratch": non-f32 output, keep a f32 VMEM accumulator.
        acc_ref = scratch[0]
        k = pl.program_id(2)

        @pl.when(k == 0)
        def _():
            acc_ref[...] = jnp.zeros_like(acc_ref)

        acc_ref[...] += part

        @pl.when(k == num_k - 1)
        def _():
            o_ref[...] = acc_ref[...].astype(o_ref.dtype)


# ----------------------------------------------------------------------------
# Tile / budget helpers
# ----------------------------------------------------------------------------
def _largest_divisor_tile(dim, align, max_tile):
    """Largest multiple of `align` that divides `dim` and is <= max_tile.

    Falls back to the full dim, which is always a legal BlockSpec extent."""
    best = None
    t = align
    lim = min(dim, max_tile)
    while t <= lim:
        if dim % t == 0:
            best = t
        t += align
    return best if best is not None else dim


def _sublane_align(dtype):
    # f32 -> 8 sublanes, bf16 -> 16, int8/fp8 -> 32 (packed vregs).
    return {4: 8, 2: 16, 1: 32}.get(jnp.dtype(dtype).itemsize, 8)


def _tpu_generation():
    """(vmem_capacity_bytes, num_tensorcores) with conservative fallbacks."""
    vmem_cap = 64 * 1024 * 1024  # conservative default (v7x per-TC VMEM)
    got_info = False
    try:
        info = pltpu.get_tpu_info()
        vmem_cap = int(getattr(info, "vmem_capacity_bytes", vmem_cap))
        got_info = True
    except Exception:
        pass
    kind = ""
    try:
        kind = jax.devices()[0].device_kind.lower()
    except Exception:
        pass
    num_tc = 2 if ("v7" in kind or (got_info and vmem_cap <= 64 * 1024 * 1024)) else 1
    return vmem_cap, num_tc


# ----------------------------------------------------------------------------
# Wrapper
# ----------------------------------------------------------------------------
@functools.partial(jax.jit, static_argnames=("n_layer", "n_head"))
def compute_qkv(x, w_t, *, n_layer, n_head):
    """ComputeQKV forward.

    x   : [B, D]
    w_t : [D, OUT] pre-transposed weight, OUT = n_layer * n_head * D
    Returns [B, n_layer, n_head, D]."""
    B, D = x.shape
    D2, OUT = w_t.shape
    assert D2 == D
    assert OUT == n_layer * n_head * D

    x_isz = jnp.dtype(x.dtype).itemsize
    w_isz = jnp.dtype(w_t.dtype).itemsize
    out_dtype = x.dtype
    out_isz = jnp.dtype(out_dtype).itemsize

    vmem_cap, num_tc = _tpu_generation()
    # Generation-aware budgets.
    w_tile_cap = max(1 << 20, vmem_cap // 8)    # ~16 MiB on 128 MiB parts, ~8 MiB on v7x
    x_res_cap = max(1 << 20, vmem_cap // 16)    # keep x resident when it fits this
    vmem_ceiling = min(100 << 20, int(vmem_cap * 0.78))

    # --- tile selection (weight-streaming regime) ----------------------------
    # Contraction tile: 128-aligned, capped at 512 so tn gets the VMEM budget.
    tk = _largest_divisor_tile(D, 128, 512)
    # Output-feature tile: as lane-dense as the per-buffer weight budget allows.
    max_tn = max(128, (w_tile_cap // max(1, tk * w_isz)) // 128 * 128)
    tn = _largest_divisor_tile(OUT, 128, min(8192, max_tn))
    # Batch tile: dtype-aware sublane alignment; full batch for small B.
    bm = _largest_divisor_tile(B, _sublane_align(x.dtype), 256)

    # v7x: make sure a 'parallel' axis has >= 2 blocks so both TensorCores run.
    if num_tc >= 2 and (B // bm) < num_tc:
        tn_split = _largest_divisor_tile(OUT, 128, max(128, OUT // num_tc))
        if OUT // tn_split >= num_tc:
            tn = min(tn, tn_split)

    num_i, num_k = B // bm, D // tk

    # x residency: whole (bm, D) slab stays in VMEM and is sliced in-kernel,
    # so x is DMA'd once per batch tile instead of once per grid step.
    x_resident = bm * D * x_isz <= x_res_cap
    slice_x = x_resident and num_k > 1

    # Accumulation strategy (static).
    if num_k == 1:
        acc_mode = "none"
    elif jnp.dtype(out_dtype) == jnp.float32:
        acc_mode = "out"
    else:
        acc_mode = "scratch"

    x_buf_elems = bm * D if x_resident else bm * tk

    def _vmem_need(w_bufs):
        need = 2 * x_buf_elems * x_isz
        need += w_bufs * tk * tn * w_isz
        need += 2 * bm * tn * out_isz
        if acc_mode == "scratch":
            need += bm * tn * 4
        return need

    # Shrink tn if the double-buffered footprint would not fit the budget.
    while _vmem_need(2) + (4 << 20) > vmem_ceiling and tn > 128:
        smaller = _largest_divisor_tile(OUT, 128, tn - 128)
        if smaller >= tn:
            break
        tn = smaller
    num_j = OUT // tn

    # Weight pipelining depth: triple-buffer only with real streaming + headroom.
    w_bufs = 3 if (num_j * num_k >= 3 and _vmem_need(3) + (8 << 20) <= vmem_ceiling) else 2

    vmem_need = _vmem_need(w_bufs)
    vmem_limit = int(min(max(vmem_need + (8 << 20), 32 << 20), vmem_ceiling))
    vmem_limit = int(min(max(vmem_limit, vmem_need + (2 << 20)), vmem_cap))

    # Accurate traffic model for XLA's scheduler (advisory).
    w_reads = num_i                         # weight streamed once per batch tile
    x_reads = 1 if x_resident else num_j    # else x re-streamed per OUT sweep
    cost = pl.CostEstimate(
        flops=2 * B * D * OUT,
        transcendentals=0,
        bytes_accessed=w_reads * D * OUT * w_isz
        + x_reads * B * D * x_isz
        + B * OUT * out_isz,
    )

    # --- specs ----------------------------------------------------------------
    if x_resident:
        x_spec = pl.BlockSpec((bm, D), lambda i, j, k: (i, 0))
    else:
        x_spec = pl.BlockSpec((bm, tk), lambda i, j, k: (i, k))

    w_index = lambda i, j, k: (k, j)
    if w_bufs > 2:
        try:
            w_spec = pl.BlockSpec((tk, tn), w_index, pipeline_mode=pl.Buffered(w_bufs))
        except TypeError:
            w_spec = pl.BlockSpec((tk, tn), w_index)
    else:
        w_spec = pl.BlockSpec((tk, tn), w_index)

    out_spec = pl.BlockSpec((bm, tn), lambda i, j, k: (i, j))

    scratch_shapes = []
    if acc_mode == "scratch":
        scratch_shapes = [pltpu.VMEM((bm, tn), jnp.float32)]

    kernel = functools.partial(
        _qkv_kernel, tk=tk, num_k=num_k, slice_x=slice_x, acc_mode=acc_mode
    )

    out_flat = pl.pallas_call(
        kernel,
        out_shape=jax.ShapeDtypeStruct((B, OUT), out_dtype),
        grid_spec=pltpu.PrefetchScalarGridSpec(
            num_scalar_prefetch=0,
            grid=(num_i, num_j, num_k),
            in_specs=[x_spec, w_spec],
            out_specs=out_spec,
            scratch_shapes=scratch_shapes,
        ),
        compiler_params=pltpu.CompilerParams(
            dimension_semantics=("parallel", "parallel", "arbitrary"),
            vmem_limit_bytes=vmem_limit,
        ),
        cost_estimate=cost,
    )(x, w_t)

    return out_flat.reshape(B, n_layer, n_head, D)


def init_linear_weight(key, in_features, out_features):
    # Match nn.Linear default init: U(-1/sqrt(in), 1/sqrt(in)), shape [out, in].
    bound = 1.0 / jnp.sqrt(jnp.float32(in_features))
    return jax.random.uniform(
        key, (out_features, in_features), jnp.float32, -bound, bound
    )


if __name__ == "__main__":
    # Small shapes consistent with the module.
    n_head = 4
    word_vec_d = 32
    n_layer = 3
    batch = 8
    out_features = n_layer * n_head * word_vec_d  # 384

    key = jax.random.PRNGKey(0)
    kx, kw = jax.random.split(key)

    x = jax.random.normal(kx, (batch, word_vec_d), jnp.float32)
    w = init_linear_weight(kw, word_vec_d, out_features)  # [OUT, D] like torch
    w_t = w.T  # [D, OUT] for the kernel (pre-transposed once, outside the hot path)

    # f32 path — matches the PyTorch reference.
    out = compute_qkv(x, w_t, n_layer=n_layer, n_head=n_head)
    out = jax.block_until_ready(out)
    ref = (x @ w.T).reshape(batch, n_layer, n_head, word_vec_d)
    assert out.shape == (batch, n_layer, n_head, word_vec_d)
    assert jnp.allclose(out, ref, atol=1e-5, rtol=1e-5)

    # bf16 weight-streaming path (production option: halves weight HBM bytes;
    # kernel still accumulates in f32 on the MXU). Looser tolerance.
    out_bf16 = compute_qkv(
        x, w_t.astype(jnp.bfloat16), n_layer=n_layer, n_head=n_head
    )
    out_bf16 = jax.block_until_ready(out_bf16)
    assert jnp.allclose(out_bf16, ref, atol=5e-2, rtol=5e-2)

    print("KERNEL_OK")
</pallas_src>

<mosaic_0001>
module attributes {stable_mosaic.version = 11 : i64} {
  func.func @_qkv_kernel(%arg0: i32, %arg1: i32, %arg2: i32, %arg3: memref<8x32xf32, #tpu.memory_space<vmem>>, %arg4: memref<32x384xf32, #tpu.memory_space<vmem>>, %arg5: memref<8x384xf32, #tpu.memory_space<vmem>>) attributes {dimension_semantics = [#tpu.dimension_semantics<parallel>, #tpu.dimension_semantics<parallel>, #tpu.dimension_semantics<arbitrary>], iteration_bounds = array<i64: 1, 1, 1>, scalar_prefetch = 0 : i64, scratch_operands = 0 : i64, tpu.core_type = #tpu.core_type<tc>, window_params = [{transform_indices = @transform_0, window_bounds = array<i64: 8, 32>}, {transform_indices = @transform_1, window_bounds = array<i64: 32, 384>}, {transform_indices = @transform_2, window_bounds = array<i64: 8, 384>}]} {
    %c0 = arith.constant 0 : index
    %c0_0 = arith.constant 0 : index
    %0 = vector.load %arg3[%c0, %c0_0] : memref<8x32xf32, #tpu.memory_space<vmem>>, vector<8x32xf32>
    %c0_1 = arith.constant 0 : index
    %c0_2 = arith.constant 0 : index
    %1 = vector.load %arg4[%c0_1, %c0_2] : memref<32x384xf32, #tpu.memory_space<vmem>>, vector<32x384xf32>
    %cst = arith.constant dense<0.000000e+00> : vector<8x384xf32>
    %2 = tpu.matmul %0, %1, %cst {dimension_numbers = #tpu.dot_dimension_numbers<[1], [0], [0], [1], [0, 0, 1, 1], [], []>} : vector<8x32xf32>, vector<32x384xf32>, vector<8x384xf32> -> vector<8x384xf32>
    %c0_3 = arith.constant 0 : index
    %c0_4 = arith.constant 0 : index
    %3 = vector.load %arg5[%c0_3, %c0_4] : memref<8x384xf32, #tpu.memory_space<vmem>>, vector<8x384xf32>
    tpu.vector_store %arg5[%c0_3, %c0_4], %2 {strides = array<i32>} : memref<8x384xf32, #tpu.memory_space<vmem>>, vector<8x384xf32>,
    return
  }
  func.func @transform_0(%arg0: i32, %arg1: i32, %arg2: i32) -> (i32, i32) {
    %c0_i32 = arith.constant 0 : i32
    %c0_i32_0 = arith.constant 0 : i32
    return %arg0, %c0_i32 : i32, i32
  }
  func.func @transform_1(%arg0: i32, %arg1: i32, %arg2: i32) -> (i32, i32) {
    %c0_i32 = arith.constant 0 : i32
    return %arg2, %arg1 : i32, i32
  }
  func.func @transform_2(%arg0: i32, %arg1: i32, %arg2: i32) -> (i32, i32) {
    %c0_i32 = arith.constant 0 : i32
    return %arg0, %arg1 : i32, i32
  }
}

</mosaic_0001>

<bundles_post_ra>
// kernel: compute_qkv.1
= control target key start
LH: loop header
LB: loop body
LE: loop exit
PB: predicated region body
PF: predicated region fallthrough
CT: control target
= control target key end

     0   :  { %7 = vsyncpa [#allocation3], 0  ;;  %s308_s0 = inlined_call_operand.hbm [shape: f32[8,32], index: 0, kind: input, shape index: {}]   ;;  %s309_s1 = inlined_call_operand.hbm [shape: f32[32,384], index: 1, kind: input, shape index: {}]   ;;  %s310_s2 = inlined_call_operand.vmem [shape: f32[8,384], index: 2, kind: output, shape index: {}]  }
   0x1   :  { %8 = vsyncpa [#allocation5], 0  ;;  %s272_s9 = smov [#allocation2]   ;;  %s273_s11 = smov [#allocation4]  }
   0x2   :  { %s15_s10 = sshll.u32 %s272_s9, 4  ;;  %s24_s12 = sshll.u32 %s273_s11, 4  ;;  %s16_s10 = int_to_ptr.vmem [resolvable:$true] %s15_s10  ;;  %s25_s12 = int_to_ptr.vmem [resolvable:$true] %s24_s12 }
   0x3   :  { %s236_s13 = scalar_lea.vmem %s16_s10, 128  ;;  %p241_p1 = scmp.lt.s32.totalorder %s16_s10, %s16_s10 }
   0x4   :  { %p237_p0 = scmp.ne.s32.totalorder %s16_s10, %s236_s13  ;;  %p242_p2 = scmp.lt.s32.totalorder %s236_s13, %s236_s13 }
   0x6   :  { %p243_p3 = por %p242_p2, %p241_p1 }
   0x8   :  { %p244_p4 = pnand %p243_p3, %p237_p0 }
   0xa   :  { %247 = shalt.err (!%p244_p4)
}
   0xb   :  { %18 = dma.hbm_to_vmem [thread:$0]  %s308_s0, 128, %s16_s10, [#allocation3]  }
   0xc   :  { %s256_s16 = scalar_lea.vmem %s25_s12, 1536  ;;  %p261_p6 = scmp.lt.s32.totalorder %s25_s12, %s25_s12 }
   0xd   :  { %p257_p5 = scmp.ne.s32.totalorder %s25_s12, %s256_s16  ;;  %p262_p7 = scmp.lt.s32.totalorder %s256_s16, %s256_s16 }
   0xf   :  { %p263_p8 = por %p262_p7, %p261_p6 }
  0x11   :  { %p264_p9 = pnand %p263_p8, %p257_p5 }
  0x13   :  { %267 = shalt.err (!%p264_p9)
}
  0x14   :  { %s274_s17 = smov 384   ;;  %s275_s18 = smov 24  }
  0x15   :  { %30 = dma.hbm_to_vmem [thread:$0]  %s309_s1, 1536, %s25_s12, [#allocation5], %s274_s17, %s274_s17, %s275_s18  }
  0x16   :  { %268 = dma.done.wait [#allocation3], 128  }
  0x17   :  { %269 = vsyncadd [#allocation3], 4294967168 }
  0x18   :  { %270 = dma.done.wait [#allocation5], 1536  }
  0x19   :  { %271 = vsyncadd [#allocation5], 4294965760  ;;  %v276_v0 = vmov 0.0   ;;  %vm277_vm0 = vmmov 0   ;;  %v48_v1 = vld [vmem:[#allocation4 + $0x50] sm:$0xff]  ;;  %v49_v2 = vld [vmem:[#allocation4 + $0x58] sm:$0xff] }
  0x1a   :  { %211 = vmatprep.subr.mxu1 %v276_v0  ;;  %219 = vmatprep.mubr.msk.f32.mxu1 %vm277_vm0, %v276_v0  ;;  %v47_v3 = vld [vmem:[#allocation4 + $0x48] sm:$0xff]  ;;  %v45_v4 = vld [vmem:[#allocation4 + $0x38] sm:$0xff]  ;;  %v46_v5 = vld [vmem:[#allocation4 + $0x40] sm:$0xff]  ;;  %vm50_vm1 = vcmask 261120  }
  0x1b   :  { %118 = vmatprep.mubr.f32.mxu0 %v276_v0  ;;  %78 = vmatprep.subr.mxu0 %v48_v1  ;;  %v44_v6 = vld [vmem:[#allocation4 + $0x30] sm:$0xff]  ;;  %v42_v7 = vld [vmem:[#allocation4 + $0x20] sm:$0xff]  ;;  %v43_v8 = vld [vmem:[#allocation4 + $0x28] sm:$0xff] }
  0x1c   :  { %212 = vmatpush3.msra.mxu1 %v49_v2  ;;  %79 = vmatpush1.msra.mxu0 %v47_v3  ;;  %v41_v9 = vld [vmem:[#allocation4 + $0x18] sm:$0xff]  ;;  %v39_v10 = vld [vmem:[#allocation4 + $0x8] sm:$0xff]  ;;  %v40_v11 = vld [vmem:[#allocation4 + $0x10] sm:$0xff] }
  0x1d   :  { %213 = vmatprep.subr.mxu1 %v276_v0  ;;  %80 = vmatprep.subr.mxu0 %v45_v4  ;;  %v38_v12 = vld [vmem:[#allocation4] sm:$0xff]  ;;  %v37_v13 = vld [vmem:[#allocation2] sm:$0xff] }
  0x1e   :  { %214 = vmatpush3.msra.mxu1 %v46_v5  ;;  %81 = vmatpush1.msra.mxu0 %v44_v6 }
  0x1f   :  { %215 = vmatprep.subr.mxu1 %v276_v0  ;;  %82 = vmatprep.subr.mxu0 %v42_v7 }
  0x20   :  { %216 = vmatpush3.msra.mxu1 %v43_v8  ;;  %83 = vmatpush1.msra.mxu0 %v41_v9 }
  0x21   :  { %217 = vmatprep.subr.mxu1 %v276_v0  ;;  %84 = vmatprep.subr.mxu0 %v39_v10 }
  0x22   :  { %218 = vmatpush3.msra.mxu1 %v40_v11  ;;  %85 = vmatpush1.msra.mxu0 %v38_v12 }
  0x23   :  { %220 = vmatmul.mubr.msk.f32.vlgmr.msra.gmra.mxu1 %vm50_vm1, %v37_v13  ;;  %204 = vmatmul.mubr.msk.f32.vlgmr.msra.gmra.mxu0 %vm50_vm1, %v37_v13 }
  0xe3   :  { %v191_v14 = vpop.f32.mrf.mxu1  ;;  %v120_v15 = vpop.f32.mrf.mxu0 }
  0xe4   :  { %197 = vst [vmem:[%s310_s2 + $0x10] sm:$0xff] %v191_v14  ;;  %195 = vst [vmem:[%s310_s2] sm:$0xff] %v120_v15 }
  0xe5   :  { %v221_v16 = vpop.f32.mrf.mxu1  ;;  %v122_v17 = vpop.f32.mrf.mxu0 }
  0xe6   :  { %196 = vst [vmem:[%s310_s2 + $0x8] sm:$0xff] %v122_v17 }
  0xe7   :  { %202 = vsyncpa [#allocation3], 1 }
  0xe8   :  { %203 = vsyncpa [#allocation5], 1 }

</bundles_post_ra>
